<compile_context>
chip_gen: v7x
topology: tpu7x:2x2x1
jax: 0.10.0
libtpu: 0.0.40
codegen_flags: <defaults>
</compile_context>

<pallas_src>
import functools
import math

import jax
import jax.numpy as jnp
from jax.experimental import pallas as pl
from jax.experimental.pallas import tpu as pltpu


def _mlp_fused_kernel(*refs, num_mid: int):
    """Fused Linear/ReLU chain; all activations stay in vregs/VMEM.

    refs = (x, w_first, b_first, [w_mid_stack, b_mid_stack,] w_last, b_last, out)
      x            : (B, D_in)          f32
      w_first      : (D_in, H)          pre-transposed (in, out)
      b_first      : (1, H)
      w_mid_stack  : (num_mid, H, H)    pre-transposed, stacked middle layers
      b_mid_stack  : (num_mid, 1, H)
      w_last       : (H, D_out)
      b_last       : (1, D_out)
      out          : (B, D_out)
    """
    x_ref = refs[0]
    w0_ref, b0_ref = refs[1], refs[2]
    if num_mid > 0:
        wm_ref, bm_ref = refs[3], refs[4]
        wl_ref, bl_ref = refs[5], refs[6]
    else:
        wl_ref, bl_ref = refs[3], refs[4]
    o_ref = refs[-1]

    # First hidden layer: Linear + ReLU.
    x = jnp.maximum(
        jnp.dot(x_ref[...], w0_ref[...], preferred_element_type=jnp.float32)
        + b0_ref[...],
        jnp.float32(0.0),
    )

    # Middle hidden layers (unrolled at trace time; static indexing into the
    # stacked VMEM-resident weight/bias tensors).
    for i in range(num_mid):
        x = jnp.maximum(
            jnp.dot(x, wm_ref[i], preferred_element_type=jnp.float32)
            + bm_ref[i],
            jnp.float32(0.0),
        )

    # Output layer: plain Linear (no ReLU).
    o_ref[...] = (
        jnp.dot(x, wl_ref[...], preferred_element_type=jnp.float32)
        + bl_ref[...]
    ).astype(o_ref.dtype)


def init_mlp_params(key, input_size, hidden_layers, hidden_neurons, output_size):
    """PyTorch-style params: list of (W (out,in), b (out,)), U(-1/sqrt(fan_in), +...)."""
    dims = [input_size] + [hidden_neurons] * hidden_layers + [output_size]
    params = []
    for i in range(len(dims) - 1):
        fan_in, fan_out = dims[i], dims[i + 1]
        key, kw, kb = jax.random.split(key, 3)
        bound = 1.0 / math.sqrt(fan_in)
        w = jax.random.uniform(kw, (fan_out, fan_in), jnp.float32, -bound, bound)
        b = jax.random.uniform(kb, (fan_out,), jnp.float32, -bound, bound)
        params.append((w, b))
    return params


def pack_params_for_kernel(params):
    """One-time prep (NOT per forward call):
      * transpose each W to (in, out) at its TRUE size (no 128-lane padding --
        padding inflated per-call weight DMA bytes ~16x at these shapes),
      * stack all identically-shaped middle hidden layers into single
        (L_mid, H, H) / (L_mid, 1, H) tensors so the kernel takes few refs
        (few DMAs) instead of 2*num_layers + 1.
    Weights stay f32 to match the PyTorch reference numerics exactly
    (bf16 weights are a further DMA/MXU win on v6e/v7x if small deviation is
    acceptable).
    """
    w0, b0 = params[0]
    wl, bl = params[-1]
    w_first = jnp.asarray(w0.T)              # (D_in, H)
    b_first = jnp.asarray(b0)[None, :]       # (1, H)
    w_last = jnp.asarray(wl.T)               # (H, D_out)
    b_last = jnp.asarray(bl)[None, :]        # (1, D_out)
    mid = params[1:-1]
    if mid:
        w_mid = jnp.stack([jnp.asarray(w.T) for w, _ in mid])        # (L_mid, H, H)
        b_mid = jnp.stack([jnp.asarray(b)[None, :] for _, b in mid])  # (L_mid, 1, H)
    else:
        w_mid, b_mid = None, None
    return {
        "w_first": w_first, "b_first": b_first,
        "w_mid": w_mid, "b_mid": b_mid,
        "w_last": w_last, "b_last": b_last,
    }


@jax.jit
def mlp_forward(x, packed):
    """x: (B, input_size) f32 -> (B, output_size) f32 via one fused Pallas kernel."""
    w_first, b_first = packed["w_first"], packed["b_first"]
    w_mid, b_mid = packed["w_mid"], packed["b_mid"]
    w_last, b_last = packed["w_last"], packed["b_last"]

    if x.ndim != 2 or x.shape[1] != w_first.shape[0]:
        raise ValueError(
            f"x has shape {x.shape}, expected (batch, {w_first.shape[0]}) to match "
            "the fan_in the packed params were built for.")

    num_mid = 0 if w_mid is None else int(w_mid.shape[0])
    B = x.shape[0]
    d_out = w_last.shape[1]

    args = [x, w_first, b_first]
    if num_mid > 0:
        args += [w_mid, b_mid]
    args += [w_last, b_last]

    # VMEM-aware: only raise the scoped VMEM limit when the resident footprint
    # actually needs it (toy shapes stay on pure defaults).
    resident_bytes = sum(int(a.size) * a.dtype.itemsize for a in args)
    resident_bytes += B * d_out * 4  # output
    compiler_params = None
    if resident_bytes > (12 << 20):  # past v5e's 16 MiB scoped default comfort zone
        compiler_params = pltpu.CompilerParams(
            vmem_limit_bytes=min(2 * resident_bytes + (4 << 20), 128 << 20))

    vmem = pl.BlockSpec(memory_space=pltpu.MemorySpace.VMEM)

    return pl.pallas_call(
        functools.partial(_mlp_fused_kernel, num_mid=num_mid),
        out_shape=jax.ShapeDtypeStruct((B, d_out), x.dtype),
        in_specs=[vmem] * len(args),
        out_specs=vmem,
        compiler_params=compiler_params,
    )(*args)


if __name__ == "__main__":
    # Shapes consistent with the module: input_size=32, hidden_layers=2,
    # hidden_neurons=32, output_size=16, batch=8.
    input_size = 32
    hidden_layers = 2
    hidden_neurons = 32
    output_size = 16
    batch = 8

    key = jax.random.PRNGKey(0)
    key, kx = jax.random.split(key)
    x = jax.random.normal(kx, (batch, input_size), dtype=jnp.float32)

    params = init_mlp_params(key, input_size, hidden_layers, hidden_neurons,
                             output_size)
    packed = pack_params_for_kernel(params)   # transpose + stack ONCE, not per call

    out = mlp_forward(x, packed)
    out = jax.block_until_ready(out)

    # Plain-JAX reference (same math as torch.nn.Linear + ReLU chain).
    ref = x
    for idx, (w, b) in enumerate(params):
        ref = ref @ w.T + b
        if idx < len(params) - 1:
            ref = jnp.maximum(ref, 0.0)

    assert out.shape == (batch, output_size)
    assert jnp.allclose(out, ref, atol=1e-5, rtol=1e-5), float(
        jnp.max(jnp.abs(out - ref)))

    print("KERNEL_OK")
</pallas_src>

<mosaic_0001>
module attributes {stable_mosaic.version = 11 : i64} {
  func.func @_mlp_fused_kernel(%arg0: memref<8x32xf32, #tpu.memory_space<vmem>>, %arg1: memref<32x32xf32, #tpu.memory_space<vmem>>, %arg2: memref<1x32xf32, #tpu.memory_space<vmem>>, %arg3: memref<1x32x32xf32, #tpu.memory_space<vmem>>, %arg4: memref<1x1x32xf32, #tpu.memory_space<vmem>>, %arg5: memref<32x16xf32, #tpu.memory_space<vmem>>, %arg6: memref<1x16xf32, #tpu.memory_space<vmem>>, %arg7: memref<8x16xf32, #tpu.memory_space<vmem>>) attributes {dimension_semantics = [], scalar_prefetch = 0 : i64, scratch_operands = 0 : i64, tpu.core_type = #tpu.core_type<tc>} {
    %c0 = arith.constant 0 : index
    %c0_0 = arith.constant 0 : index
    %0 = vector.load %arg0[%c0, %c0_0] : memref<8x32xf32, #tpu.memory_space<vmem>>, vector<8x32xf32>
    %c0_1 = arith.constant 0 : index
    %c0_2 = arith.constant 0 : index
    %1 = vector.load %arg1[%c0_1, %c0_2] : memref<32x32xf32, #tpu.memory_space<vmem>>, vector<32x32xf32>
    %cst = arith.constant dense<0.000000e+00> : vector<8x32xf32>
    %2 = tpu.matmul %0, %1, %cst {dimension_numbers = #tpu.dot_dimension_numbers<[1], [0], [0], [1], [0, 0, 1, 1], [], []>} : vector<8x32xf32>, vector<32x32xf32>, vector<8x32xf32> -> vector<8x32xf32>
    %c0_3 = arith.constant 0 : index
    %c0_4 = arith.constant 0 : index
    %3 = vector.load %arg2[%c0_3, %c0_4] : memref<1x32xf32, #tpu.memory_space<vmem>>, vector<1x32xf32>
    %4 = vector.broadcast %3 : vector<1x32xf32> to vector<8x32xf32>
    %5 = arith.addf %2, %4 : vector<8x32xf32>
    %cst_5 = arith.constant 0.000000e+00 : f32
    %6 = vector.broadcast %cst_5 : f32 to vector<8x32xf32>
    %7 = arith.maximumf %5, %6 : vector<8x32xf32>
    %c0_6 = arith.constant 0 : index
    %c0_7 = arith.constant 0 : index
    %c0_8 = arith.constant 0 : index
    %8 = vector.load %arg3[%c0_6, %c0_7, %c0_8] : memref<1x32x32xf32, #tpu.memory_space<vmem>>, vector<1x32x32xf32>
    %9 = vector.shape_cast %8 : vector<1x32x32xf32> to vector<32x32xf32>
    %cst_9 = arith.constant dense<0.000000e+00> : vector<8x32xf32>
    %10 = tpu.matmul %7, %9, %cst_9 {dimension_numbers = #tpu.dot_dimension_numbers<[1], [0], [0], [1], [0, 0, 1, 1], [], []>} : vector<8x32xf32>, vector<32x32xf32>, vector<8x32xf32> -> vector<8x32xf32>
    %c0_10 = arith.constant 0 : index
    %c0_11 = arith.constant 0 : index
    %c0_12 = arith.constant 0 : index
    %11 = vector.load %arg4[%c0_10, %c0_11, %c0_12] : memref<1x1x32xf32, #tpu.memory_space<vmem>>, vector<1x1x32xf32>
    %12 = vector.shape_cast %11 : vector<1x1x32xf32> to vector<1x32xf32>
    %13 = vector.broadcast %12 : vector<1x32xf32> to vector<8x32xf32>
    %14 = arith.addf %10, %13 : vector<8x32xf32>
    %cst_13 = arith.constant 0.000000e+00 : f32
    %15 = vector.broadcast %cst_13 : f32 to vector<8x32xf32>
    %16 = arith.maximumf %14, %15 : vector<8x32xf32>
    %c0_14 = arith.constant 0 : index
    %c0_15 = arith.constant 0 : index
    %17 = vector.load %arg5[%c0_14, %c0_15] : memref<32x16xf32, #tpu.memory_space<vmem>>, vector<32x16xf32>
    %cst_16 = arith.constant dense<0.000000e+00> : vector<8x16xf32>
    %18 = tpu.matmul %16, %17, %cst_16 {dimension_numbers = #tpu.dot_dimension_numbers<[1], [0], [0], [1], [0, 0, 1, 1], [], []>} : vector<8x32xf32>, vector<32x16xf32>, vector<8x16xf32> -> vector<8x16xf32>
    %c0_17 = arith.constant 0 : index
    %c0_18 = arith.constant 0 : index
    %19 = vector.load %arg6[%c0_17, %c0_18] : memref<1x16xf32, #tpu.memory_space<vmem>>, vector<1x16xf32>
    %20 = vector.broadcast %19 : vector<1x16xf32> to vector<8x16xf32>
    %21 = arith.addf %18, %20 : vector<8x16xf32>
    %c0_19 = arith.constant 0 : index
    %c0_20 = arith.constant 0 : index
    %22 = vector.load %arg7[%c0_19, %c0_20] : memref<8x16xf32, #tpu.memory_space<vmem>>, vector<8x16xf32>
    tpu.vector_store %arg7[%c0_19, %c0_20], %21 {strides = array<i32>} : memref<8x16xf32, #tpu.memory_space<vmem>>, vector<8x16xf32>,
    return
  }
}

</mosaic_0001>

<bundles_post_ra>
// kernel: mlp_forward.1
= control target key start
LH: loop header
LB: loop body
LE: loop exit
PB: predicated region body
PF: predicated region fallthrough
CT: control target
= control target key end

     0   :  { %12 = vsyncpa [#allocation3], 0  ;;  %s605_s0 = inlined_call_operand.hbm [shape: f32[8,32], index: 0, kind: input, shape index: {}]   ;;  %s606_s1 = inlined_call_operand.vmem [shape: f32[32,32], index: 1, kind: input, shape index: {}]   ;;  %s607_s2 = inlined_call_operand.vmem [shape: f32[1,32], index: 2, kind: input, shape index: {}]   ;;  %s608_s3 = inlined_call_operand.vmem [shape: f32[1,32,32], index: 3, kind: input, shape index: {}]   ;;  %s609_s4 = inlined_call_operand.vmem [shape: f32[1,1,32], index: 4, kind: input, shape index: {}]   ;;  %s610_s5 = inlined_call_operand.vmem [shape: f32[32,16], index: 5, kind: input, shape index: {}]   ;;  %s611_s6 = inlined_call_operand.hbm [shape: f32[1,16], index: 6, kind: input, shape index: {}]   ;;  %s612_s7 = inlined_call_operand.hbm [shape: f32[8,16], index: 7, kind: output, shape index: {}]  }
   0x1   :  { %13 = vsyncpa [#allocation6], 0 }
   0x2   :  { %14 = vsyncpa [#allocation4], 0  ;;  %s475_s24 = smov [#allocation2]   ;;  %s476_s26 = smov [#allocation5]  }
   0x3   :  { %s21_s25 = sshll.u32 %s475_s24, 4  ;;  %s41_s27 = sshll.u32 %s476_s26, 4  ;;  %s22_s25 = int_to_ptr.vmem [resolvable:$true] %s21_s25  ;;  %s42_s27 = int_to_ptr.vmem [resolvable:$true] %s41_s27 }
   0x4   :  { %s403_s30 = scalar_lea.hbm %s605_s0, 128 }
   0x5   :  { %p404_p0 = scmp.ne.s32.totalorder %s605_s0, %s403_s30  ;;  %p407_p1 = scmp.lt.u32.totalorder %s403_s30, %s605_s0 }
   0x7   :  { %p409_p2 = pnand %p407_p1, %p404_p0 }
   0x9   :  { %412 = shalt.err (!%p409_p2)
}
   0xa   :  { %s413_s12 = scalar_lea.vmem %s22_s25, 128  ;;  %p418_p4 = scmp.lt.s32.totalorder %s22_s25, %s22_s25 }
   0xb   :  { %p414_p3 = scmp.ne.s32.totalorder %s22_s25, %s413_s12  ;;  %p419_p5 = scmp.lt.s32.totalorder %s413_s12, %s413_s12 }
   0xd   :  { %p420_p6 = por %p419_p5, %p418_p4 }
   0xf   :  { %p421_p7 = pnand %p420_p6, %p414_p3 }
  0x11   :  { %424 = shalt.err (!%p421_p7)
}
  0x12   :  { %24 = dma.hbm_to_vmem [thread:$0]  %s605_s0, 128, %s22_s25, [#allocation3]  }
  0x13   :  { %s425_s17 = scalar_lea.hbm %s611_s6, 16 }
  0x14   :  { %p426_p8 = scmp.ne.s32.totalorder %s611_s6, %s425_s17  ;;  %p429_p9 = scmp.lt.u32.totalorder %s425_s17, %s611_s6 }
  0x16   :  { %p431_p10 = pnand %p429_p9, %p426_p8 }
  0x18   :  { %434 = shalt.err (!%p431_p10)
}
  0x19   :  { %s435_s22 = scalar_lea.vmem %s42_s27, 16  ;;  %s439_s23 = scalar_lea.vmem %s42_s27, 32 }
  0x1a   :  { %p436_p11 = scmp.ne.s32.totalorder %s42_s27, %s435_s22  ;;  %p440_p12 = scmp.lt.s32.totalorder %s42_s27, %s42_s27 }
  0x1b   :  { %p441_p13 = scmp.lt.s32.totalorder %s439_s23, %s435_s22 }
  0x1d   :  { %p442_p0 = por %p441_p13, %p440_p12 }
  0x1f   :  { %p443_p1 = pnand %p442_p0, %p436_p11 }
  0x21   :  { %446 = shalt.err (!%p443_p1)
}
  0x22   :  { %44 = dma.hbm_to_vmem [thread:$0]  %s611_s6, 16, %s42_s27, [#allocation6]  }
  0x23   :  { %469 = dma.done.wait [#allocation3], 128  }
  0x24   :  { %470 = vsyncadd [#allocation3], 4294967168 }
  0x25   :  { %471 = dma.done.wait [#allocation6], 16  }
  0x26   :  { %472 = vsyncadd [#allocation6], 4294967280  ;;  %v477_v0 = vmov 0.0|0.0   ;;  %vm478_vm0 = vmmov 0   ;;  %v479_v1 = vmov 0.0   ;;  %v52_v2 = vld [vmem:[%s606_s1] sm:$0xff] }
  0x27   :  { %379 = vmatprep.subr.bf16.mxu0 %v477_v0  ;;  %354 = vmatprep.mubr.msk.f32.mxu0 %vm478_vm0, %v479_v1  ;;  %v53_v3 = vld [vmem:[%s606_s1 + $0x8] sm:$0xff]  ;;  %v54_v4 = vld [vmem:[%s606_s1 + $0x10] sm:$0xff]  ;;  %v55_v6 = vld [vmem:[%s606_s1 + $0x18] sm:$0xff]  ;;  %vm63_vm1 = vcmask 261120   ;;  %vm307_vm2 = vcmask 130048  }
  0x28   :  { %385 = vmatprep.subr.bf16.mxu1 %v477_v0  ;;  %365 = vmatprep.mubr.msk.f32.mxu1 %vm478_vm0, %v479_v1  ;;  %v380_v5 = vpack.c.bf16 %v53_v3, %v52_v2  ;;  %v138_v7 = vld [vmem:[%s608_s3] sm:$0xff]  ;;  %v139_v8 = vld [vmem:[%s608_s3 + $0x8] sm:$0xff]  ;;  %v383_v9 = vpack.c.bf16 %v55_v6, %v54_v4  ;;  %v140_v12 = vld [vmem:[%s608_s3 + $0x10] sm:$0xff] }
  0x29   :  { %v386_v10 = vpack.c.bf16 %v139_v8, %v138_v7  ;;  %v51_v11 = vld [vmem:[#allocation2] sm:$0xff]  ;;  %v141_v13 = vld [vmem:[%s608_s3 + $0x18] sm:$0xff]  ;;  %v224_v16 = vld [vmem:[%s610_s5 + $0x8] sm:$0xff] }
  0x2a   :  { %381 = vmatpush3.bf16.msra.mxu0 %v380_v5  ;;  %v389_v14 = vpack.c.bf16 %v141_v13, %v140_v12  ;;  %v223_v15 = vld [vmem:[%s610_s5] sm:$0xff]  ;;  %v225_v23 = vld [vmem:[%s610_s5 + $0x10] sm:$0xff]  ;;  %v226_v24 = vld [vmem:[%s610_s5 + $0x18] sm:$0xff] }
  0x2b   :  { %382 = vmatprep.subr.bf16.mxu0 %v477_v0  ;;  %387 = vmatpush3.bf16.msra.mxu1 %v386_v10  ;;  %v392_v17 = vpack.c.bf16 %v224_v16, %v223_v15  ;;  %v325_v18 = vld [vmem:[%s607_s2] ss:$0 sm:$0xff]  ;;  %v395_v25 = vpack.c.bf16 %v226_v24, %v225_v23  ;;  %v329_v31 = vld [vmem:[#allocation5] ss:$0 sm:$0xff]  ;;  %s480_s2 = smov [#allocation7]  }
  0x2c   :  { %388 = vmatprep.subr.bf16.mxu1 %v477_v0  ;;  %v327_v26 = vld [vmem:[%s609_s4] ss:$0 sm:$0xff]  ;;  %s315_s26 = sshll.u32 %s480_s2, 4  ;;  %s316_s26 = int_to_ptr.vmem [resolvable:$true] %s315_s26 }
  0x2d   :  { %s447_s5 = scalar_lea.vmem %s316_s26, 128  ;;  %p452_p3 = scmp.lt.s32.totalorder %s316_s26, %s316_s26 }
  0x2e   :  { %384 = vmatpush3.bf16.msra.mxu0 %v383_v9  ;;  %p448_p2 = scmp.ne.s32.totalorder %s316_s26, %s447_s5  ;;  %p453_p4 = scmp.lt.s32.totalorder %s447_s5, %s447_s5 }
  0x2f   :  { %391 = vmatprep.subr.bf16.mxu0 %v477_v0  ;;  %390 = vmatpush3.bf16.msra.mxu1 %v389_v14 }
  0x30   :  { %p454_p5 = por %p453_p4, %p452_p3 }
  0x31   :  { %355 = vmatmul.mubr.msk.f32.vlgmr.msra.gmra.mrb[0].mxu0 %vm63_vm1, %v51_v11 }
  0x32   :  { %376 = vmatprep.mubr.msk.f32.mxu0 %vm478_vm0, %v479_v1  ;;  %393 = vmatpush3.bf16.msra.mxu0 %v392_v17  ;;  %p455_p6 = pnand %p454_p5, %p448_p2 }
  0x33   :  { %394 = vmatprep.subr.bf16.mxu0 %v477_v0 }
  0x36   :  { %396 = vmatpush3.bf16.msra.mxu0 %v395_v25 }
 0x104   :  { %v133_v19 = vpop.f32.mrb[0].mxu0 }
 0x105   :  { %v134_v20 = vadd.f32 %v325_v18, %v133_v19  ;;  %v356_v21 = vpop.f32.mrb[1].mxu0 }
 0x107   :  { %v137_v22 = vmax.f32 %v134_v20, 0.0 }
 0x109   :  { %366 = vmatmul.mubr.msk.f32.vlgmr.msra.gmra.mrb[0].mxu1 %vm63_vm1, %v137_v22 }
 0x1dc   :  { %v218_v27 = vpop.f32.mrb[0].mxu1 }
 0x1dd   :  { %v219_v28 = vadd.f32 %v327_v26, %v218_v27  ;;  %v367_v29 = vpop.f32.mrb[1].mxu1 }
 0x1df   :  { %v222_v30 = vmax.f32 %v219_v28, 0.0 }
 0x1e1   :  { %377 = vmatmul.mubr.msk.f32.vlgmr.msra.gmra.mrb[2].mxu0 %vm63_vm1, %v222_v30 }
 0x2b4   :  { %v303_v32 = vpop.f32.mrb[2].mxu0 }
 0x2b5   :  { %v304_v33 = vadd.f32 %v329_v31, %v303_v32  ;;  %v378_v34 = vpop.f32.mrb[3].mxu0 }
 0x2b7   :  { %308 = vst.msk [vmem:[#allocation7] sm:$0xff] %vm307_vm2, %v304_v33 }
 0x2b8   :  { %458 = shalt.err (!%p455_p6)
}
 0x2b9   :  { %s459_s29 = scalar_lea.hbm %s612_s7, 128 }
 0x2ba   :  { %p460_p7 = scmp.ne.s32.totalorder %s612_s7, %s459_s29  ;;  %p463_p8 = scmp.lt.u32.totalorder %s459_s29, %s612_s7 }
 0x2bc   :  { %p465_p9 = pnand %p463_p8, %p460_p7 }
 0x2be   :  { %468 = shalt.err (!%p465_p9)
}
 0x2bf   :  { %318 = dma.vmem_to_hbm [thread:$0]  %s316_s26, 128, %s612_s7, [#allocation4]  }
 0x2c0   :  { %473 = dma.done.wait [#allocation4], 128  }
 0x2c1   :  { %474 = vsyncadd [#allocation4], 4294967168 }
 0x2c2   :  { %322 = vsyncpa [#allocation3], 1 }
 0x2c3   :  { %323 = vsyncpa [#allocation6], 1 }
 0x2c4   :  { %324 = vsyncpa [#allocation4], 1 }

</bundles_post_ra>
